<compile_context>
chip_gen: v7x
topology: tpu7x:2x2x1
jax: 0.10.0
libtpu: 0.0.40
codegen_flags: <defaults>
</compile_context>

<pallas_src>
import functools
import math

import jax
import jax.numpy as jnp
from jax.experimental import pallas as pl
from jax.experimental.pallas import tpu as pltpu

LANE = 128
SUBLANE = 8
_SLAB_MAX = 512   # lane-aligned slab width over the packed (j, o) column axis


def _cdiv(a, b):
    return (a + b - 1) // b


def _round_up(n, m):
    return _cdiv(n, m) * m


def _round_down(n, m):
    return (n // m) * m


def widenet_kernel(x_ref, v_ref, rw_ref, m2_ref, b_ref, o_ref, *, slabs):
    """One batch tile of the fused WideNet forward.

    x_ref:  (TB, D)       input tile (pipelined / double-buffered)
    v_ref:  (D, KO1p)     packed vparams: column j*O1 + o = V_o[:, j]
    rw_ref: (KO1p, O2p)   0.5 * W.T replicated over the K factors (folds K-reduce + affine)
    m2_ref: (D, O2p)      -0.5 * (sum_j V^2) @ W.T  (sum_of_square path, pre-reduced)
    b_ref:  (1, O2p)      padded bias
    o_ref:  (TB, O2p)     lane-dense output tile
    """
    x = x_ref[...]                                                     # (TB, D)

    # sum_of_square contribution + bias (tiny D x O2p matmul, f32).
    acc = jnp.dot(x * x, m2_ref[...], preferred_element_type=jnp.float32) + b_ref[...]

    # square_of_sum contribution, processed in lane-aligned slabs of the packed
    # (j, o) axis so no (TB, K*O1) temporaries are ever live.  f32 throughout:
    # the s^2 - q cancellation sits inside these accumulations.
    for start, size in slabs:
        s = jnp.dot(x, v_ref[:, start:start + size],
                    preferred_element_type=jnp.float32)                # (TB, size)
        acc = acc + jnp.dot(s * s, rw_ref[start:start + size, :],
                            preferred_element_type=jnp.float32)        # (TB, O2p)

    o_ref[...] = acc


def pack_widenet_params(v_params, w, b):
    """One-time repack of WideNet parameters into lane-dense kernel operands.

    v_params: (O1, D, K)  vparam of each CrossProduct
    w:        (O2, O1)    nn.Linear weight
    b:        (O2,)       nn.Linear bias
    """
    O1, D, K = v_params.shape
    O2, O1w = w.shape
    assert O1w == O1

    KO1 = K * O1
    KO1p = _round_up(KO1, LANE)
    O2p = _round_up(O2, LANE)

    vf = jnp.asarray(v_params, jnp.float32)
    wf = jnp.asarray(w, jnp.float32)
    bf = jnp.asarray(b, jnp.float32)

    # Packed vparams: column j*O1 + o holds V_o[:, j]; a single pad to a lane multiple.
    vpack = jnp.transpose(vf, (1, 2, 0)).reshape(D, KO1)               # (D, K*O1)
    vpack = jnp.pad(vpack, ((0, 0), (0, KO1p - KO1)))

    # square_of_sum path folded with the affine: row j*O1 + o = 0.5 * W[:, o].
    rw = 0.5 * jnp.tile(wf.T, (K, 1))                                  # (K*O1, O2)
    rw = jnp.pad(rw, ((0, KO1p - KO1), (0, O2p - O2)))

    # sum_of_square path pre-reduced over j and folded with the affine.
    g = jnp.sum(vf * vf, axis=2)                                       # (O1, D)
    m2 = -0.5 * jnp.dot(g.T, wf.T, precision=jax.lax.Precision.HIGHEST)  # (D, O2)
    m2 = jnp.pad(m2, ((0, 0), (0, O2p - O2)))

    bias = jnp.zeros((1, O2p), jnp.float32).at[0, :O2].set(bf)

    return {"vpack": vpack, "rw": rw, "m2": m2, "bias": bias,
            "dims": (D, K, O1, O2, KO1p, O2p)}


def _vmem_capacity_bytes():
    try:
        return int(pltpu.get_tpu_info().vmem_capacity_bytes)
    except Exception:
        return 64 * 1024 * 1024   # conservative default: v7x per-TensorCore VMEM


def _choose_batch_tile(B, D, KO1p, O2p, vmem_cap):
    """Batch-tile size: as large as the VMEM budget allows, but split into at
    least two (even #) grid steps for non-tiny batches so v7x's two TensorCores
    both get work, and rounded so batch padding stays below one tile."""
    itemsize = 4
    slab = min(KO1p, _SLAB_MAX)
    # Single-buffered resident weights + double-buffered x/out tiles + live temps.
    resident = itemsize * (D * KO1p + KO1p * O2p + D * O2p + O2p)
    per_row = itemsize * (4 * D + 4 * O2p + 2 * slab)
    budget = int(0.70 * vmem_cap)                    # ~30% headroom
    tb_cap = (budget - resident) // max(per_row, 1)
    tb_cap = max(SUBLANE, min(2048, _round_down(max(tb_cap, SUBLANE), SUBLANE)))

    if B <= 2 * SUBLANE:
        n_steps = 1                                  # tiny batch: nothing to shard
    else:
        n_steps = max(2, _cdiv(B, tb_cap))
        if n_steps % 2:
            n_steps += 1                             # even -> balanced across 2 TCs
    tb = min(tb_cap, _round_up(_cdiv(B, n_steps), SUBLANE))
    return max(tb, SUBLANE)


def widenet_forward(x, packed, *, interpret=False):
    """WideNet forward on a packed parameter set (see pack_widenet_params).

    x: (B, D) float32  ->  (B, O2) float32
    """
    D, K, O1, O2, KO1p, O2p = packed["dims"]
    B, Dx = x.shape
    assert Dx == D

    vmem_cap = _vmem_capacity_bytes()
    TB = _choose_batch_tile(B, D, KO1p, O2p, vmem_cap)
    Bp = _round_up(B, TB)
    x = x.astype(jnp.float32)
    x_pad = jnp.pad(x, ((0, Bp - B), (0, 0))) if Bp != B else x
    grid = (Bp // TB,)

    slabs = tuple((s, min(_SLAB_MAX, KO1p - s)) for s in range(0, KO1p, _SLAB_MAX))

    # Generation-aware VMEM request: clamp to the real device capacity (64 MiB/TC
    # on v7x, 128 MiB on v5e/v6e) with ~10% headroom, never a fixed 128 MiB cap.
    itemsize = 4
    resident = itemsize * (D * KO1p + KO1p * O2p + D * O2p + O2p)
    per_row = itemsize * (4 * D + 4 * O2p + 2 * min(KO1p, _SLAB_MAX))
    need = resident + TB * per_row
    vmem_limit = int(max(32 * 1024 * 1024, min(int(0.9 * vmem_cap), 2 * need)))

    flops = 2 * Bp * (D * KO1p + KO1p * O2p + D * O2p)
    bytes_accessed = itemsize * (
        Bp * D + D * KO1p + KO1p * O2p + D * O2p + O2p + Bp * O2p)

    def build(single_buffer_weights):
        def wspec(shape):
            # Constant-index-map weights: keep a single VMEM-resident buffer.
            if single_buffer_weights:
                return pl.BlockSpec(shape, lambda i: (0, 0),
                                    pipeline_mode=pl.Buffered(1))
            return pl.BlockSpec(shape, lambda i: (0, 0))

        return pl.pallas_call(
            functools.partial(widenet_kernel, slabs=slabs),
            out_shape=jax.ShapeDtypeStruct((Bp, O2p), jnp.float32),
            grid_spec=pltpu.PrefetchScalarGridSpec(
                num_scalar_prefetch=0,
                grid=grid,
                in_specs=[
                    pl.BlockSpec((TB, D), lambda i: (i, 0)),  # x tile (pipelined)
                    wspec((D, KO1p)),      # packed vparams (VMEM-resident)
                    wspec((KO1p, O2p)),    # 0.5 * tiled W.T
                    wspec((D, O2p)),       # -0.5 * (sum_j V^2) @ W.T
                    wspec((1, O2p)),       # bias
                ],
                out_specs=pl.BlockSpec((TB, O2p), lambda i: (i, 0)),
            ),
            compiler_params=pltpu.CompilerParams(
                dimension_semantics=("parallel",),
                vmem_limit_bytes=vmem_limit,
            ),
            cost_estimate=pl.CostEstimate(
                flops=int(flops),
                transcendentals=0,
                bytes_accessed=int(bytes_accessed)),
            interpret=interpret,
        )

    args = (x_pad, packed["vpack"], packed["rw"], packed["m2"], packed["bias"])
    try:
        out_padded = jax.block_until_ready(build(True)(*args))
    except Exception:
        # pipeline_mode=pl.Buffered(1) unsupported on this jax version: fall back
        # to default (double-buffered) weight specs; semantics are unchanged.
        out_padded = jax.block_until_ready(build(False)(*args))

    # Slice off batch / lane padding.
    return out_padded[:B, :O2]


def widenet_reference(x, v_params, w, b):
    """Pure-JAX reference mirroring the PyTorch WideNet math."""
    V = jnp.transpose(v_params, (1, 0, 2))                       # (D, O1, K)
    xv = x[:, :, None, None] * V[None, :, :, :]                  # (B, D, O1, K)
    square_of_sum = jnp.sum(xv, axis=1) ** 2                     # (B, O1, K)
    sum_of_square = jnp.sum(xv ** 2, axis=1)                     # (B, O1, K)
    y = 0.5 * jnp.sum(square_of_sum - sum_of_square, axis=-1)    # (B, O1)
    return y @ w.T + b                                           # (B, O2)


if __name__ == "__main__":
    # Small shapes consistent with WideNet.forward: x is (batch, in_feature).
    batch = 8
    x_dim = 16          # in_feature
    v_dim = 8           # k
    out_feature_1 = 4   # CP layer width
    out_feature_2 = 3   # affine output width

    key = jax.random.PRNGKey(0)
    kx, kv, kw, kb = jax.random.split(key, 4)

    x = jax.random.normal(kx, (batch, x_dim), dtype=jnp.float32)

    # Deterministic init matching PyTorch reset_parameter: uniform(-stdv, stdv),
    # stdv = 1/sqrt(k), one vparam per CP output feature.
    stdv = 1.0 / math.sqrt(v_dim)
    v_params = jax.random.uniform(
        kv, (out_feature_1, x_dim, v_dim), dtype=jnp.float32,
        minval=-stdv, maxval=stdv)

    # nn.Linear-style init.
    lin_bound = 1.0 / math.sqrt(out_feature_1)
    w = jax.random.uniform(
        kw, (out_feature_2, out_feature_1), dtype=jnp.float32,
        minval=-lin_bound, maxval=lin_bound)
    b = jax.random.uniform(
        kb, (out_feature_2,), dtype=jnp.float32,
        minval=-lin_bound, maxval=lin_bound)

    # One-time parameter repack (hoisted off the forward hot path).
    packed = pack_widenet_params(v_params, w, b)

    out = widenet_forward(x, packed)
    out = jax.block_until_ready(out)

    ref = widenet_reference(x, v_params, w, b)
    assert out.shape == (batch, out_feature_2), out.shape
    assert jnp.allclose(out, ref, atol=1e-5, rtol=1e-5), (out, ref)

    print("KERNEL_OK")
</pallas_src>

<mosaic_0001>
module attributes {stable_mosaic.version = 11 : i64} {
  func.func @widenet_kernel(%arg0: i32, %arg1: memref<8x16xf32, #tpu.memory_space<vmem>>, %arg2: memref<16x128xf32, #tpu.memory_space<vmem>>, %arg3: memref<128x128xf32, #tpu.memory_space<vmem>>, %arg4: memref<16x128xf32, #tpu.memory_space<vmem>>, %arg5: memref<1x128xf32, #tpu.memory_space<vmem>>, %arg6: memref<8x128xf32, #tpu.memory_space<vmem>>) attributes {dimension_semantics = [#tpu.dimension_semantics<parallel>], iteration_bounds = array<i64: 1>, scalar_prefetch = 0 : i64, scratch_operands = 0 : i64, tpu.core_type = #tpu.core_type<tc>, window_params = [{transform_indices = @transform_0, window_bounds = array<i64: 8, 16>}, {pipeline_mode = #tpu.pipeline_mode<synchronous>, transform_indices = @transform_1, window_bounds = array<i64: 16, 128>}, {pipeline_mode = #tpu.pipeline_mode<synchronous>, transform_indices = @transform_2, window_bounds = array<i64: 128, 128>}, {pipeline_mode = #tpu.pipeline_mode<synchronous>, transform_indices = @transform_3, window_bounds = array<i64: 16, 128>}, {pipeline_mode = #tpu.pipeline_mode<synchronous>, transform_indices = @transform_4, window_bounds = array<i64: 1, 128>}, {transform_indices = @transform_5, window_bounds = array<i64: 8, 128>}]} {
    %c0 = arith.constant 0 : index
    %c0_0 = arith.constant 0 : index
    %0 = vector.load %arg1[%c0, %c0_0] : memref<8x16xf32, #tpu.memory_space<vmem>>, vector<8x16xf32>
    %1 = arith.mulf %0, %0 : vector<8x16xf32>
    %c0_1 = arith.constant 0 : index
    %c0_2 = arith.constant 0 : index
    %2 = vector.load %arg4[%c0_1, %c0_2] : memref<16x128xf32, #tpu.memory_space<vmem>>, vector<16x128xf32>
    %cst = arith.constant dense<0.000000e+00> : vector<8x128xf32>
    %3 = tpu.matmul %1, %2, %cst {dimension_numbers = #tpu.dot_dimension_numbers<[1], [0], [0], [1], [0, 0, 1, 1], [], []>} : vector<8x16xf32>, vector<16x128xf32>, vector<8x128xf32> -> vector<8x128xf32>
    %c0_3 = arith.constant 0 : index
    %c0_4 = arith.constant 0 : index
    %4 = vector.load %arg5[%c0_3, %c0_4] : memref<1x128xf32, #tpu.memory_space<vmem>>, vector<1x128xf32>
    %5 = vector.broadcast %4 : vector<1x128xf32> to vector<8x128xf32>
    %6 = arith.addf %3, %5 : vector<8x128xf32>
    %c0_5 = arith.constant 0 : index
    %c0_6 = arith.constant 0 : index
    %7 = vector.load %arg2[%c0_5, %c0_6] : memref<16x128xf32, #tpu.memory_space<vmem>>, vector<16x128xf32>
    %cst_7 = arith.constant dense<0.000000e+00> : vector<8x128xf32>
    %8 = tpu.matmul %0, %7, %cst_7 {dimension_numbers = #tpu.dot_dimension_numbers<[1], [0], [0], [1], [0, 0, 1, 1], [], []>} : vector<8x16xf32>, vector<16x128xf32>, vector<8x128xf32> -> vector<8x128xf32>
    %9 = arith.mulf %8, %8 : vector<8x128xf32>
    %c0_8 = arith.constant 0 : index
    %c0_9 = arith.constant 0 : index
    %10 = vector.load %arg3[%c0_8, %c0_9] : memref<128x128xf32, #tpu.memory_space<vmem>>, vector<128x128xf32>
    %cst_10 = arith.constant dense<0.000000e+00> : vector<8x128xf32>
    %11 = tpu.matmul %9, %10, %cst_10 {dimension_numbers = #tpu.dot_dimension_numbers<[1], [0], [0], [1], [0, 0, 1, 1], [], []>} : vector<8x128xf32>, vector<128x128xf32>, vector<8x128xf32> -> vector<8x128xf32>
    %12 = arith.addf %6, %11 : vector<8x128xf32>
    %c0_11 = arith.constant 0 : index
    %c0_12 = arith.constant 0 : index
    %13 = vector.load %arg6[%c0_11, %c0_12] : memref<8x128xf32, #tpu.memory_space<vmem>>, vector<8x128xf32>
    tpu.vector_store %arg6[%c0_11, %c0_12], %12 {strides = array<i32>} : memref<8x128xf32, #tpu.memory_space<vmem>>, vector<8x128xf32>,
    return
  }
  func.func @transform_0(%arg0: i32) -> (i32, i32) {
    %c0_i32 = arith.constant 0 : i32
    %c0_i32_0 = arith.constant 0 : i32
    return %arg0, %c0_i32 : i32, i32
  }
  func.func @transform_1(%arg0: i32) -> (i32, i32) {
    %c0_i32 = arith.constant 0 : i32
    %c0_i32_0 = arith.constant 0 : i32
    %c0_i32_1 = arith.constant 0 : i32
    return %c0_i32, %c0_i32_0 : i32, i32
  }
  func.func @transform_2(%arg0: i32) -> (i32, i32) {
    %c0_i32 = arith.constant 0 : i32
    %c0_i32_0 = arith.constant 0 : i32
    %c0_i32_1 = arith.constant 0 : i32
    return %c0_i32, %c0_i32_0 : i32, i32
  }
  func.func @transform_3(%arg0: i32) -> (i32, i32) {
    %c0_i32 = arith.constant 0 : i32
    %c0_i32_0 = arith.constant 0 : i32
    %c0_i32_1 = arith.constant 0 : i32
    return %c0_i32, %c0_i32_0 : i32, i32
  }
  func.func @transform_4(%arg0: i32) -> (i32, i32) {
    %c0_i32 = arith.constant 0 : i32
    %c0_i32_0 = arith.constant 0 : i32
    %c0_i32_1 = arith.constant 0 : i32
    return %c0_i32, %c0_i32_0 : i32, i32
  }
  func.func @transform_5(%arg0: i32) -> (i32, i32) {
    %c0_i32 = arith.constant 0 : i32
    %c0_i32_0 = arith.constant 0 : i32
    return %arg0, %c0_i32 : i32, i32
  }
}

module attributes {stable_mosaic.version = 11 : i64} {
  func.func @widenet_kernel(%arg0: i32, %arg1: memref<8x16xf32, #tpu.memory_space<vmem>>, %arg2: memref<16x128xf32, #tpu.memory_space<vmem>>, %arg3: memref<128x128xf32, #tpu.memory_space<vmem>>, %arg4: memref<16x128xf32, #tpu.memory_space<vmem>>, %arg5: memref<1x128xf32, #tpu.memory_space<vmem>>, %arg6: memref<8x128xf32, #tpu.memory_space<vmem>>) attributes {dimension_semantics = [#tpu.dimension_semantics<parallel>], iteration_bounds = array<i64: 1>, scalar_prefetch = 0 : i64, scratch_operands = 0 : i64, tpu.core_type = #tpu.core_type<tc>, window_params = [{transform_indices = @transform_0, window_bounds = array<i64: 8, 16>}, {pipeline_mode = #tpu.pipeline_mode<synchronous>, transform_indices = @transform_1, window_bounds = array<i64: 16, 128>}, {pipeline_mode = #tpu.pipeline_mode<synchronous>, transform_indices = @transform_2, window_bounds = array<i64: 128, 128>}, {pipeline_mode = #tpu.pipeline_mode<synchronous>, transform_indices = @transform_3, window_bounds = array<i64: 16, 128>}, {pipeline_mode = #tpu.pipeline_mode<synchronous>, transform_indices = @transform_4, window_bounds = array<i64: 1, 128>}, {transform_indices = @transform_5, window_bounds = array<i64: 8, 128>}]} {
    %c0 = arith.constant 0 : index
    %c0_0 = arith.constant 0 : index
    %0 = vector.load %arg1[%c0, %c0_0] : memref<8x16xf32, #tpu.memory_space<vmem>>, vector<8x16xf32>
    %1 = arith.mulf %0, %0 : vector<8x16xf32>
    %c0_1 = arith.constant 0 : index
    %c0_2 = arith.constant 0 : index
    %2 = vector.load %arg4[%c0_1, %c0_2] : memref<16x128xf32, #tpu.memory_space<vmem>>, vector<16x128xf32>
    %cst = arith.constant dense<0.000000e+00> : vector<8x128xf32>
    %3 = tpu.matmul %1, %2, %cst {dimension_numbers = #tpu.dot_dimension_numbers<[1], [0], [0], [1], [0, 0, 1, 1], [], []>} : vector<8x16xf32>, vector<16x128xf32>, vector<8x128xf32> -> vector<8x128xf32>
    %c0_3 = arith.constant 0 : index
    %c0_4 = arith.constant 0 : index
    %4 = vector.load %arg5[%c0_3, %c0_4] : memref<1x128xf32, #tpu.memory_space<vmem>>, vector<1x128xf32>
    %5 = vector.broadcast %4 : vector<1x128xf32> to vector<8x128xf32>
    %6 = arith.addf %3, %5 : vector<8x128xf32>
    %c0_5 = arith.constant 0 : index
    %c0_6 = arith.constant 0 : index
    %7 = vector.load %arg2[%c0_5, %c0_6] : memref<16x128xf32, #tpu.memory_space<vmem>>, vector<16x128xf32>
    %cst_7 = arith.constant dense<0.000000e+00> : vector<8x128xf32>
    %8 = tpu.matmul %0, %7, %cst_7 {dimension_numbers = #tpu.dot_dimension_numbers<[1], [0], [0], [1], [0, 0, 1, 1], [], []>} : vector<8x16xf32>, vector<16x128xf32>, vector<8x128xf32> -> vector<8x128xf32>
    %9 = arith.mulf %8, %8 : vector<8x128xf32>
    %c0_8 = arith.constant 0 : index
    %c0_9 = arith.constant 0 : index
    %10 = vector.load %arg3[%c0_8, %c0_9] : memref<128x128xf32, #tpu.memory_space<vmem>>, vector<128x128xf32>
    %cst_10 = arith.constant dense<0.000000e+00> : vector<8x128xf32>
    %11 = tpu.matmul %9, %10, %cst_10 {dimension_numbers = #tpu.dot_dimension_numbers<[1], [0], [0], [1], [0, 0, 1, 1], [], []>} : vector<8x128xf32>, vector<128x128xf32>, vector<8x128xf32> -> vector<8x128xf32>
    %12 = arith.addf %6, %11 : vector<8x128xf32>
    %c0_11 = arith.constant 0 : index
    %c0_12 = arith.constant 0 : index
    %13 = vector.load %arg6[%c0_11, %c0_12] : memref<8x128xf32, #tpu.memory_space<vmem>>, vector<8x128xf32>
    tpu.vector_store %arg6[%c0_11, %c0_12], %12 {strides = array<i32>} : memref<8x128xf32, #tpu.memory_space<vmem>>, vector<8x128xf32>,
    return
  }
  func.func @transform_0(%arg0: i32) -> (i32, i32) {
    %c0_i32 = arith.constant 0 : i32
    %c0_i32_0 = arith.constant 0 : i32
    return %arg0, %c0_i32 : i32, i32
  }
  func.func @transform_1(%arg0: i32) -> (i32, i32) {
    %c0_i32 = arith.constant 0 : i32
    %c0_i32_0 = arith.constant 0 : i32
    %c0_i32_1 = arith.constant 0 : i32
    return %c0_i32, %c0_i32_0 : i32, i32
  }
  func.func @transform_2(%arg0: i32) -> (i32, i32) {
    %c0_i32 = arith.constant 0 : i32
    %c0_i32_0 = arith.constant 0 : i32
    %c0_i32_1 = arith.constant 0 : i32
    return %c0_i32, %c0_i32_0 : i32, i32
  }
  func.func @transform_3(%arg0: i32) -> (i32, i32) {
    %c0_i32 = arith.constant 0 : i32
    %c0_i32_0 = arith.constant 0 : i32
    %c0_i32_1 = arith.constant 0 : i32
    return %c0_i32, %c0_i32_0 : i32, i32
  }
  func.func @transform_4(%arg0: i32) -> (i32, i32) {
    %c0_i32 = arith.constant 0 : i32
    %c0_i32_0 = arith.constant 0 : i32
    %c0_i32_1 = arith.constant 0 : i32
    return %c0_i32, %c0_i32_0 : i32, i32
  }
  func.func @transform_5(%arg0: i32) -> (i32, i32) {
    %c0_i32 = arith.constant 0 : i32
    %c0_i32_0 = arith.constant 0 : i32
    return %arg0, %c0_i32 : i32, i32
  }
}

</mosaic_0001>

<bundles_post_ra>
// kernel: tpu_custom_call.1
= control target key start
LH: loop header
LB: loop body
LE: loop exit
PB: predicated region body
PF: predicated region fallthrough
CT: control target
= control target key end

     0   :  { %10 = vsyncpa [#allocation3], 0  ;;  %s690_s0 = inlined_call_operand.hbm [shape: f32[8,16], index: 0, kind: input, shape index: {}]   ;;  %s691_s1 = inlined_call_operand.hbm [shape: f32[16,128], index: 1, kind: input, shape index: {}]   ;;  %s692_s2 = inlined_call_operand.hbm [shape: f32[128,128], index: 2, kind: input, shape index: {}]   ;;  %s693_s3 = inlined_call_operand.hbm [shape: f32[16,128], index: 3, kind: input, shape index: {}]   ;;  %s694_s4 = inlined_call_operand.vmem [shape: f32[1,128], index: 4, kind: input, shape index: {}]   ;;  %s695_s5 = inlined_call_operand.hbm [shape: f32[8,128], index: 5, kind: output, shape index: {}]  }
   0x1   :  { %11 = vsyncpa [#allocation6], 0 }
   0x2   :  { %12 = vsyncpa [#allocation9], 0 }
   0x3   :  { %13 = vsyncpa [#allocation4], 0  ;;  %s575_s18 = smov [#allocation5]   ;;  %s457_s22 = scalar_lea.hbm %s691_s1, 256 }
   0x4   :  { %s29_s19 = sshll.u32 %s575_s18, 4  ;;  %p458_p0 = scmp.ne.s32.totalorder %s691_s1, %s457_s22  ;;  %s30_s19 = int_to_ptr.vmem [resolvable:$true] %s29_s19 }
   0x5   :  { %p461_p1 = scmp.lt.u32.totalorder %s457_s22, %s691_s1 }
   0x7   :  { %p463_p2 = pnand %p461_p1, %p458_p0 }
   0x9   :  { %466 = shalt.err (!%p463_p2)
}
   0xa   :  { %s467_s27 = scalar_lea.vmem %s30_s19, 256  ;;  %p472_p4 = scmp.lt.s32.totalorder %s30_s19, %s30_s19 }
   0xb   :  { %p468_p3 = scmp.ne.s32.totalorder %s30_s19, %s467_s27  ;;  %p473_p5 = scmp.lt.s32.totalorder %s467_s27, %s467_s27 }
   0xd   :  { %p474_p6 = por %p473_p5, %p472_p4 }
   0xf   :  { %p475_p7 = pnand %p474_p6, %p468_p3 }
  0x11   :  { %478 = shalt.err (!%p475_p7)
}
  0x12   :  { %s576_s28 = smov 128   ;;  %s577_s29 = smov 8  }
  0x13   :  { %35 = dma.hbm_to_vmem [thread:$0]  %s691_s1, 256, %s30_s19, [#allocation6], %s576_s28, %s576_s28, %s577_s29  }
  0x14   :  { %s578_s7 = smov [#allocation2]   ;;  %s579_s9 = smov [#allocation7]  }
  0x15   :  { %s20_s8 = sshll.u32 %s578_s7, 4  ;;  %s41_s10 = sshll.u32 %s579_s9, 4  ;;  %s21_s8 = int_to_ptr.vmem [resolvable:$true] %s20_s8  ;;  %s42_s10 = int_to_ptr.vmem [resolvable:$true] %s41_s10 }
  0x16   :  { %s479_s13 = scalar_lea.hbm %s690_s0, 128 }
  0x17   :  { %p480_p8 = scmp.ne.s32.totalorder %s690_s0, %s479_s13  ;;  %p483_p9 = scmp.lt.u32.totalorder %s479_s13, %s690_s0 }
  0x19   :  { %p485_p10 = pnand %p483_p9, %p480_p8 }
  0x1b   :  { %488 = shalt.err (!%p485_p10)
}
  0x1c   :  { %s489_s1 = scalar_lea.vmem %s21_s8, 128  ;;  %p494_p12 = scmp.lt.s32.totalorder %s21_s8, %s21_s8 }
  0x1d   :  { %p490_p11 = scmp.ne.s32.totalorder %s21_s8, %s489_s1  ;;  %p495_p13 = scmp.lt.s32.totalorder %s489_s1, %s489_s1 }
  0x1f   :  { %p496_p0 = por %p495_p13, %p494_p12 }
  0x21   :  { %p497_p1 = pnand %p496_p0, %p490_p11 }
  0x23   :  { %500 = shalt.err (!%p497_p1)
}
  0x24   :  { %23 = dma.hbm_to_vmem [thread:$0]  %s690_s0, 128, %s21_s8, [#allocation3]  }
  0x25   :  { %s501_s22 = scalar_lea.hbm %s692_s2, 2048 }
  0x26   :  { %p502_p2 = scmp.ne.s32.totalorder %s692_s2, %s501_s22  ;;  %p505_p3 = scmp.lt.u32.totalorder %s501_s22, %s692_s2 }
  0x28   :  { %p507_p4 = pnand %p505_p3, %p502_p2 }
  0x2a   :  { %510 = shalt.err (!%p507_p4)
}
  0x2b   :  { %s511_s27 = scalar_lea.vmem %s42_s10, 2048  ;;  %p516_p6 = scmp.lt.s32.totalorder %s42_s10, %s42_s10 }
  0x2c   :  { %p512_p5 = scmp.ne.s32.totalorder %s42_s10, %s511_s27  ;;  %p517_p7 = scmp.lt.s32.totalorder %s511_s27, %s511_s27 }
  0x2e   :  { %p518_p8 = por %p517_p7, %p516_p6 }
  0x30   :  { %p519_p9 = pnand %p518_p8, %p512_p5 }
  0x32   :  { %522 = shalt.err (!%p519_p9)
}
  0x33   :  { %47 = dma.hbm_to_vmem [thread:$0]  %s692_s2, 2048, %s42_s10, [#allocation6], %s576_s28, %s576_s28, %s577_s29  }
  0x34   :  { %s580_s6 = smov [#allocation8]   ;;  %s523_s11 = scalar_lea.hbm %s693_s3, 256 }
  0x35   :  { %s53_s7 = sshll.u32 %s580_s6, 4  ;;  %p524_p10 = scmp.ne.s32.totalorder %s693_s3, %s523_s11  ;;  %s54_s7 = int_to_ptr.vmem [resolvable:$true] %s53_s7 }
  0x36   :  { %p527_p11 = scmp.lt.u32.totalorder %s523_s11, %s693_s3 }
  0x38   :  { %p529_p12 = pnand %p527_p11, %p524_p10 }
  0x3a   :  { %532 = shalt.err (!%p529_p12)
}
  0x3b   :  { %s533_s16 = scalar_lea.vmem %s54_s7, 256  ;;  %p538_p0 = scmp.lt.s32.totalorder %s54_s7, %s54_s7 }
  0x3c   :  { %p534_p13 = scmp.ne.s32.totalorder %s54_s7, %s533_s16  ;;  %p539_p1 = scmp.lt.s32.totalorder %s533_s16, %s533_s16 }
  0x3e   :  { %p540_p2 = por %p539_p1, %p538_p0 }
  0x40   :  { %p541_p3 = pnand %p540_p2, %p534_p13 }
  0x42   :  { %544 = shalt.err (!%p541_p3)
}
  0x43   :  { %59 = dma.hbm_to_vmem [thread:$0]  %s693_s3, 256, %s54_s7, [#allocation9], %s576_s28, %s576_s28, %s577_s29  }
  0x44   :  { %567 = dma.done.wait [#allocation3], 128  }
  0x45   :  { %568 = vsyncadd [#allocation3], 4294967168 }
  0x46   :  { %569 = dma.done.wait [#allocation6], 2304  }
  0x47   :  { %570 = vsyncadd [#allocation6], 4294964992 }
  0x48   :  { %571 = dma.done.wait [#allocation9], 256  }
  0x49   :  { %572 = vsyncadd [#allocation9], 4294967040  ;;  %v581_v0 = vmov 0.0|0.0   ;;  %vm582_vm0 = vmmov 0   ;;  %v583_v1 = vmov 0.0   ;;  %v76_v2 = vld [vmem:[#allocation8] sm:$0xff] }
  0x4a   :  { %415 = vmatprep.subr.bf16.mxu1 %v581_v0  ;;  %370 = vmatprep.mubr.msk.f32.mxu1 %vm582_vm0, %v583_v1  ;;  %v77_v3 = vld [vmem:[#allocation8 + $0x8] sm:$0xff]  ;;  %v159_v6 = vld [vmem:[#allocation5] sm:$0xff]  ;;  %v160_v7 = vld [vmem:[#allocation5 + $0x8] sm:$0xff]  ;;  %vm85_vm1 = vcmask 130048   ;;  %s584_s29 = smov [#allocation10]  }
  0x4b   :  { %421 = vmatprep.subr.bf16.mxu0 %v581_v0  ;;  %412 = vmatprep.mubr.msk.f32.mxu0 %vm582_vm0, %v583_v1  ;;  %v74_v4 = vld [vmem:[#allocation2] sm:$0xff]  ;;  %v416_v5 = vpack.c.bf16 %v77_v3, %v76_v2  ;;  %v235_v8 = vld [vmem:[#allocation7] sm:$0xff]  ;;  %v237_v11 = vld [vmem:[#allocation7 + $0x10] sm:$0xff]  ;;  %v419_v13 = vpack.c.bf16 %v160_v7, %v159_v6  ;;  %s329_s17 = sshll.u32 %s584_s29, 4  ;;  %s330_s17 = int_to_ptr.vmem [resolvable:$true] %s329_s17 }
  0x4c   :  { %v75_v9 = vmul.f32 %v74_v4, %v74_v4  ;;  %v236_v10 = vld [vmem:[#allocation7 + $0x8] sm:$0xff]  ;;  %v238_v12 = vld [vmem:[#allocation7 + $0x18] sm:$0xff]  ;;  %v239_v16 = vld [vmem:[#allocation7 + $0x20] sm:$0xff]  ;;  %s545_s1 = scalar_lea.vmem %s330_s17, 128  ;;  %p550_p5 = scmp.lt.s32.totalorder %s330_s17, %s330_s17 }
  0x4d   :  { %417 = vmatpush3.bf16.msra.mxu1 %v416_v5  ;;  %v422_v14 = vpack.c.bf16 %v236_v10, %v235_v8  ;;  %v425_v15 = vpack.c.bf16 %v238_v12, %v237_v11  ;;  %v240_v17 = vld [vmem:[#allocation7 + $0x28] sm:$0xff]  ;;  %v241_v19 = vld [vmem:[#allocation7 + $0x30] sm:$0xff]  ;;  %v242_v20 = vld [vmem:[#allocation7 + $0x38] sm:$0xff]  ;;  %p546_p4 = scmp.ne.s32.totalorder %s330_s17, %s545_s1  ;;  %p551_p6 = scmp.lt.s32.totalorder %s545_s1, %s545_s1 }
  0x4e   :  { %418 = vmatprep.subr.bf16.mxu1 %v581_v0  ;;  %v428_v18 = vpack.c.bf16 %v240_v17, %v239_v16  ;;  %v431_v21 = vpack.c.bf16 %v242_v20, %v241_v19  ;;  %v243_v22 = vld [vmem:[#allocation7 + $0x40] sm:$0xff]  ;;  %v244_v23 = vld [vmem:[#allocation7 + $0x48] sm:$0xff]  ;;  %v245_v25 = vld [vmem:[#allocation7 + $0x50] sm:$0xff] }
  0x4f   :  { %423 = vmatpush3.bf16.msra.mxu0 %v422_v14  ;;  %v434_v24 = vpack.c.bf16 %v244_v23, %v243_v22  ;;  %v246_v26 = vld [vmem:[#allocation7 + $0x58] sm:$0xff]  ;;  %v247_v28 = vld [vmem:[#allocation7 + $0x60] sm:$0xff]  ;;  %v248_v29 = vld [vmem:[#allocation7 + $0x68] sm:$0xff]  ;;  %p552_p7 = por %p551_p6, %p550_p5 }
  0x50   :  { %371 = vmatmul.mubr.msk.f32.vlgmr.msra.gmra.mrb[0].mxu1 %vm85_vm1, %v75_v9  ;;  %424 = vmatprep.subr.bf16.mxu0 %v581_v0  ;;  %v437_v27 = vpack.c.bf16 %v246_v26, %v245_v25  ;;  %v440_v30 = vpack.c.bf16 %v248_v29, %v247_v28  ;;  %v249_v31 = vld [vmem:[#allocation7 + $0x70] sm:$0xff]  ;;  %v250_v32 = vld [vmem:[#allocation7 + $0x78] sm:$0xff]  ;;  %v340_v39 = vld [vmem:[%s694_s4] ss:$0 sm:$0xff] }
  0x51   :  { %420 = vmatpush3.bf16.msra.mxu1 %v419_v13  ;;  %377 = vmatprep.mubr.msk.f32.mxu1 %vm582_vm0, %v583_v1  ;;  %v443_v33 = vpack.c.bf16 %v250_v32, %v249_v31  ;;  %p553_p8 = pnand %p552_p7, %p546_p4 }
  0x53   :  { %426 = vmatpush3.bf16.msra.mxu0 %v425_v15 }
  0x54   :  { %378 = vmatmul.mubr.msk.f32.vlgmr.msra.gmra.mrb[2].mxu1 %vm85_vm1, %v74_v4  ;;  %427 = vmatprep.subr.bf16.mxu0 %v581_v0 }
  0x57   :  { %429 = vmatpush3.bf16.msra.mxu0 %v428_v18 }
  0x58   :  { %430 = vmatprep.subr.bf16.mxu0 %v581_v0 }
  0x5b   :  { %432 = vmatpush3.bf16.msra.mxu0 %v431_v21 }
  0x5c   :  { %433 = vmatprep.subr.bf16.mxu0 %v581_v0 }
  0x5f   :  { %435 = vmatpush3.bf16.msra.mxu0 %v434_v24 }
  0x60   :  { %436 = vmatprep.subr.bf16.mxu0 %v581_v0 }
  0x63   :  { %438 = vmatpush3.bf16.msra.mxu0 %v437_v27 }
  0x64   :  { %439 = vmatprep.subr.bf16.mxu0 %v581_v0 }
  0x67   :  { %441 = vmatpush3.bf16.msra.mxu0 %v440_v30 }
  0x68   :  { %442 = vmatprep.subr.bf16.mxu0 %v581_v0 }
  0x6b   :  { %444 = vmatpush3.bf16.msra.mxu0 %v443_v33 }
 0x123   :  { %v155_v34 = vpop.f32.mrb[0].mxu1 }
 0x124   :  { %v372_v35 = vpop.f32.mrb[1].mxu1  ;;  %v156_v40 = vadd.f32 %v340_v39, %v155_v34 }
 0x127   :  { %v230_v36 = vpop.f32.mrb[2].mxu1 }
 0x128   :  { %v234_v37 = vmul.f32 %v230_v36, %v230_v36  ;;  %v379_v38 = vpop.f32.mrb[3].mxu1 }
 0x12a   :  { %413 = vmatmul.mubr.f32.vlgmr.msra.gmra.mrb[0].mxu0 %v234_v37 }
 0x1fd   :  { %v317_v41 = vpop.f32.mrb[0].mxu0 }
 0x1fe   :  { %v321_v42 = vadd.f32 %v317_v41, %v156_v40  ;;  %v414_v43 = vpop.f32.mrb[1].mxu0 }
 0x200   :  { %322 = vst [vmem:[#allocation10] sm:$0xff] %v321_v42 }
 0x201   :  { %556 = shalt.err (!%p553_p8)
}
 0x202   :  { %s557_s20 = scalar_lea.hbm %s695_s5, 128 }
 0x203   :  { %p558_p9 = scmp.ne.s32.totalorder %s695_s5, %s557_s20  ;;  %p561_p10 = scmp.lt.u32.totalorder %s557_s20, %s695_s5 }
 0x205   :  { %p563_p11 = pnand %p561_p10, %p558_p9 }
 0x207   :  { %566 = shalt.err (!%p563_p11)
}
 0x208   :  { %332 = dma.vmem_to_hbm [thread:$0]  %s330_s17, 128, %s695_s5, [#allocation4]  }
 0x209   :  { %573 = dma.done.wait [#allocation4], 128  }
 0x20a   :  { %574 = vsyncadd [#allocation4], 4294967168 }
 0x20b   :  { %336 = vsyncpa [#allocation3], 1 }
 0x20c   :  { %337 = vsyncpa [#allocation6], 1 }
 0x20d   :  { %338 = vsyncpa [#allocation9], 1 }
 0x20e   :  { %339 = vsyncpa [#allocation4], 1 }

// kernel: tpu_custom_call.1
= control target key start
LH: loop header
LB: loop body
LE: loop exit
PB: predicated region body
PF: predicated region fallthrough
CT: control target
= control target key end

     0   :  { %10 = vsyncpa [#allocation3], 0  ;;  %s690_s0 = inlined_call_operand.hbm [shape: f32[8,16], index: 0, kind: input, shape index: {}]   ;;  %s691_s1 = inlined_call_operand.hbm [shape: f32[16,128], index: 1, kind: input, shape index: {}]   ;;  %s692_s2 = inlined_call_operand.hbm [shape: f32[128,128], index: 2, kind: input, shape index: {}]   ;;  %s693_s3 = inlined_call_operand.hbm [shape: f32[16,128], index: 3, kind: input, shape index: {}]   ;;  %s694_s4 = inlined_call_operand.vmem [shape: f32[1,128], index: 4, kind: input, shape index: {}]   ;;  %s695_s5 = inlined_call_operand.hbm [shape: f32[8,128], index: 5, kind: output, shape index: {}]  }
   0x1   :  { %11 = vsyncpa [#allocation6], 0 }
   0x2   :  { %12 = vsyncpa [#allocation9], 0 }
   0x3   :  { %13 = vsyncpa [#allocation4], 0  ;;  %s575_s18 = smov [#allocation5]   ;;  %s457_s22 = scalar_lea.hbm %s691_s1, 256 }
   0x4   :  { %s29_s19 = sshll.u32 %s575_s18, 4  ;;  %p458_p0 = scmp.ne.s32.totalorder %s691_s1, %s457_s22  ;;  %s30_s19 = int_to_ptr.vmem [resolvable:$true] %s29_s19 }
   0x5   :  { %p461_p1 = scmp.lt.u32.totalorder %s457_s22, %s691_s1 }
   0x7   :  { %p463_p2 = pnand %p461_p1, %p458_p0 }
   0x9   :  { %466 = shalt.err (!%p463_p2)
}
   0xa   :  { %s467_s27 = scalar_lea.vmem %s30_s19, 256  ;;  %p472_p4 = scmp.lt.s32.totalorder %s30_s19, %s30_s19 }
   0xb   :  { %p468_p3 = scmp.ne.s32.totalorder %s30_s19, %s467_s27  ;;  %p473_p5 = scmp.lt.s32.totalorder %s467_s27, %s467_s27 }
   0xd   :  { %p474_p6 = por %p473_p5, %p472_p4 }
   0xf   :  { %p475_p7 = pnand %p474_p6, %p468_p3 }
  0x11   :  { %478 = shalt.err (!%p475_p7)
}
  0x12   :  { %s576_s28 = smov 128   ;;  %s577_s29 = smov 8  }
  0x13   :  { %35 = dma.hbm_to_vmem [thread:$0]  %s691_s1, 256, %s30_s19, [#allocation6], %s576_s28, %s576_s28, %s577_s29  }
  0x14   :  { %s578_s7 = smov [#allocation2]   ;;  %s579_s9 = smov [#allocation7]  }
  0x15   :  { %s20_s8 = sshll.u32 %s578_s7, 4  ;;  %s41_s10 = sshll.u32 %s579_s9, 4  ;;  %s21_s8 = int_to_ptr.vmem [resolvable:$true] %s20_s8  ;;  %s42_s10 = int_to_ptr.vmem [resolvable:$true] %s41_s10 }
  0x16   :  { %s479_s13 = scalar_lea.hbm %s690_s0, 128 }
  0x17   :  { %p480_p8 = scmp.ne.s32.totalorder %s690_s0, %s479_s13  ;;  %p483_p9 = scmp.lt.u32.totalorder %s479_s13, %s690_s0 }
  0x19   :  { %p485_p10 = pnand %p483_p9, %p480_p8 }
  0x1b   :  { %488 = shalt.err (!%p485_p10)
}
  0x1c   :  { %s489_s1 = scalar_lea.vmem %s21_s8, 128  ;;  %p494_p12 = scmp.lt.s32.totalorder %s21_s8, %s21_s8 }
  0x1d   :  { %p490_p11 = scmp.ne.s32.totalorder %s21_s8, %s489_s1  ;;  %p495_p13 = scmp.lt.s32.totalorder %s489_s1, %s489_s1 }
  0x1f   :  { %p496_p0 = por %p495_p13, %p494_p12 }
  0x21   :  { %p497_p1 = pnand %p496_p0, %p490_p11 }
  0x23   :  { %500 = shalt.err (!%p497_p1)
}
  0x24   :  { %23 = dma.hbm_to_vmem [thread:$0]  %s690_s0, 128, %s21_s8, [#allocation3]  }
  0x25   :  { %s501_s22 = scalar_lea.hbm %s692_s2, 2048 }
  0x26   :  { %p502_p2 = scmp.ne.s32.totalorder %s692_s2, %s501_s22  ;;  %p505_p3 = scmp.lt.u32.totalorder %s501_s22, %s692_s2 }
  0x28   :  { %p507_p4 = pnand %p505_p3, %p502_p2 }
  0x2a   :  { %510 = shalt.err (!%p507_p4)
}
  0x2b   :  { %s511_s27 = scalar_lea.vmem %s42_s10, 2048  ;;  %p516_p6 = scmp.lt.s32.totalorder %s42_s10, %s42_s10 }
  0x2c   :  { %p512_p5 = scmp.ne.s32.totalorder %s42_s10, %s511_s27  ;;  %p517_p7 = scmp.lt.s32.totalorder %s511_s27, %s511_s27 }
  0x2e   :  { %p518_p8 = por %p517_p7, %p516_p6 }
  0x30   :  { %p519_p9 = pnand %p518_p8, %p512_p5 }
  0x32   :  { %522 = shalt.err (!%p519_p9)
}
  0x33   :  { %47 = dma.hbm_to_vmem [thread:$0]  %s692_s2, 2048, %s42_s10, [#allocation6], %s576_s28, %s576_s28, %s577_s29  }
  0x34   :  { %s580_s6 = smov [#allocation8]   ;;  %s523_s11 = scalar_lea.hbm %s693_s3, 256 }
  0x35   :  { %s53_s7 = sshll.u32 %s580_s6, 4  ;;  %p524_p10 = scmp.ne.s32.totalorder %s693_s3, %s523_s11  ;;  %s54_s7 = int_to_ptr.vmem [resolvable:$true] %s53_s7 }
  0x36   :  { %p527_p11 = scmp.lt.u32.totalorder %s523_s11, %s693_s3 }
  0x38   :  { %p529_p12 = pnand %p527_p11, %p524_p10 }
  0x3a   :  { %532 = shalt.err (!%p529_p12)
}
  0x3b   :  { %s533_s16 = scalar_lea.vmem %s54_s7, 256  ;;  %p538_p0 = scmp.lt.s32.totalorder %s54_s7, %s54_s7 }
  0x3c   :  { %p534_p13 = scmp.ne.s32.totalorder %s54_s7, %s533_s16  ;;  %p539_p1 = scmp.lt.s32.totalorder %s533_s16, %s533_s16 }
  0x3e   :  { %p540_p2 = por %p539_p1, %p538_p0 }
  0x40   :  { %p541_p3 = pnand %p540_p2, %p534_p13 }
  0x42   :  { %544 = shalt.err (!%p541_p3)
}
  0x43   :  { %59 = dma.hbm_to_vmem [thread:$0]  %s693_s3, 256, %s54_s7, [#allocation9], %s576_s28, %s576_s28, %s577_s29  }
  0x44   :  { %567 = dma.done.wait [#allocation3], 128  }
  0x45   :  { %568 = vsyncadd [#allocation3], 4294967168 }
  0x46   :  { %569 = dma.done.wait [#allocation6], 2304  }
  0x47   :  { %570 = vsyncadd [#allocation6], 4294964992 }
  0x48   :  { %571 = dma.done.wait [#allocation9], 256  }
  0x49   :  { %572 = vsyncadd [#allocation9], 4294967040  ;;  %v581_v0 = vmov 0.0|0.0   ;;  %vm582_vm0 = vmmov 0   ;;  %v583_v1 = vmov 0.0   ;;  %v76_v2 = vld [vmem:[#allocation8] sm:$0xff] }
  0x4a   :  { %415 = vmatprep.subr.bf16.mxu1 %v581_v0  ;;  %370 = vmatprep.mubr.msk.f32.mxu1 %vm582_vm0, %v583_v1  ;;  %v77_v3 = vld [vmem:[#allocation8 + $0x8] sm:$0xff]  ;;  %v159_v6 = vld [vmem:[#allocation5] sm:$0xff]  ;;  %v160_v7 = vld [vmem:[#allocation5 + $0x8] sm:$0xff]  ;;  %vm85_vm1 = vcmask 130048   ;;  %s584_s29 = smov [#allocation10]  }
  0x4b   :  { %421 = vmatprep.subr.bf16.mxu0 %v581_v0  ;;  %412 = vmatprep.mubr.msk.f32.mxu0 %vm582_vm0, %v583_v1  ;;  %v74_v4 = vld [vmem:[#allocation2] sm:$0xff]  ;;  %v416_v5 = vpack.c.bf16 %v77_v3, %v76_v2  ;;  %v235_v8 = vld [vmem:[#allocation7] sm:$0xff]  ;;  %v237_v11 = vld [vmem:[#allocation7 + $0x10] sm:$0xff]  ;;  %v419_v13 = vpack.c.bf16 %v160_v7, %v159_v6  ;;  %s329_s17 = sshll.u32 %s584_s29, 4  ;;  %s330_s17 = int_to_ptr.vmem [resolvable:$true] %s329_s17 }
  0x4c   :  { %v75_v9 = vmul.f32 %v74_v4, %v74_v4  ;;  %v236_v10 = vld [vmem:[#allocation7 + $0x8] sm:$0xff]  ;;  %v238_v12 = vld [vmem:[#allocation7 + $0x18] sm:$0xff]  ;;  %v239_v16 = vld [vmem:[#allocation7 + $0x20] sm:$0xff]  ;;  %s545_s1 = scalar_lea.vmem %s330_s17, 128  ;;  %p550_p5 = scmp.lt.s32.totalorder %s330_s17, %s330_s17 }
  0x4d   :  { %417 = vmatpush3.bf16.msra.mxu1 %v416_v5  ;;  %v422_v14 = vpack.c.bf16 %v236_v10, %v235_v8  ;;  %v425_v15 = vpack.c.bf16 %v238_v12, %v237_v11  ;;  %v240_v17 = vld [vmem:[#allocation7 + $0x28] sm:$0xff]  ;;  %v241_v19 = vld [vmem:[#allocation7 + $0x30] sm:$0xff]  ;;  %v242_v20 = vld [vmem:[#allocation7 + $0x38] sm:$0xff]  ;;  %p546_p4 = scmp.ne.s32.totalorder %s330_s17, %s545_s1  ;;  %p551_p6 = scmp.lt.s32.totalorder %s545_s1, %s545_s1 }
  0x4e   :  { %418 = vmatprep.subr.bf16.mxu1 %v581_v0  ;;  %v428_v18 = vpack.c.bf16 %v240_v17, %v239_v16  ;;  %v431_v21 = vpack.c.bf16 %v242_v20, %v241_v19  ;;  %v243_v22 = vld [vmem:[#allocation7 + $0x40] sm:$0xff]  ;;  %v244_v23 = vld [vmem:[#allocation7 + $0x48] sm:$0xff]  ;;  %v245_v25 = vld [vmem:[#allocation7 + $0x50] sm:$0xff] }
  0x4f   :  { %423 = vmatpush3.bf16.msra.mxu0 %v422_v14  ;;  %v434_v24 = vpack.c.bf16 %v244_v23, %v243_v22  ;;  %v246_v26 = vld [vmem:[#allocation7 + $0x58] sm:$0xff]  ;;  %v247_v28 = vld [vmem:[#allocation7 + $0x60] sm:$0xff]  ;;  %v248_v29 = vld [vmem:[#allocation7 + $0x68] sm:$0xff]  ;;  %p552_p7 = por %p551_p6, %p550_p5 }
  0x50   :  { %371 = vmatmul.mubr.msk.f32.vlgmr.msra.gmra.mrb[0].mxu1 %vm85_vm1, %v75_v9  ;;  %424 = vmatprep.subr.bf16.mxu0 %v581_v0  ;;  %v437_v27 = vpack.c.bf16 %v246_v26, %v245_v25  ;;  %v440_v30 = vpack.c.bf16 %v248_v29, %v247_v28  ;;  %v249_v31 = vld [vmem:[#allocation7 + $0x70] sm:$0xff]  ;;  %v250_v32 = vld [vmem:[#allocation7 + $0x78] sm:$0xff]  ;;  %v340_v39 = vld [vmem:[%s694_s4] ss:$0 sm:$0xff] }
  0x51   :  { %420 = vmatpush3.bf16.msra.mxu1 %v419_v13  ;;  %377 = vmatprep.mubr.msk.f32.mxu1 %vm582_vm0, %v583_v1  ;;  %v443_v33 = vpack.c.bf16 %v250_v32, %v249_v31  ;;  %p553_p8 = pnand %p552_p7, %p546_p4 }
  0x53   :  { %426 = vmatpush3.bf16.msra.mxu0 %v425_v15 }
  0x54   :  { %378 = vmatmul.mubr.msk.f32.vlgmr.msra.gmra.mrb[2].mxu1 %vm85_vm1, %v74_v4  ;;  %427 = vmatprep.subr.bf16.mxu0 %v581_v0 }
  0x57   :  { %429 = vmatpush3.bf16.msra.mxu0 %v428_v18 }
  0x58   :  { %430 = vmatprep.subr.bf16.mxu0 %v581_v0 }
  0x5b   :  { %432 = vmatpush3.bf16.msra.mxu0 %v431_v21 }
  0x5c   :  { %433 = vmatprep.subr.bf16.mxu0 %v581_v0 }
  0x5f   :  { %435 = vmatpush3.bf16.msra.mxu0 %v434_v24 }
  0x60   :  { %436 = vmatprep.subr.bf16.mxu0 %v581_v0 }
  0x63   :  { %438 = vmatpush3.bf16.msra.mxu0 %v437_v27 }
  0x64   :  { %439 = vmatprep.subr.bf16.mxu0 %v581_v0 }
  0x67   :  { %441 = vmatpush3.bf16.msra.mxu0 %v440_v30 }
  0x68   :  { %442 = vmatprep.subr.bf16.mxu0 %v581_v0 }
  0x6b   :  { %444 = vmatpush3.bf16.msra.mxu0 %v443_v33 }
 0x123   :  { %v155_v34 = vpop.f32.mrb[0].mxu1 }
 0x124   :  { %v372_v35 = vpop.f32.mrb[1].mxu1  ;;  %v156_v40 = vadd.f32 %v340_v39, %v155_v34 }
 0x127   :  { %v230_v36 = vpop.f32.mrb[2].mxu1 }
 0x128   :  { %v234_v37 = vmul.f32 %v230_v36, %v230_v36  ;;  %v379_v38 = vpop.f32.mrb[3].mxu1 }
 0x12a   :  { %413 = vmatmul.mubr.f32.vlgmr.msra.gmra.mrb[0].mxu0 %v234_v37 }
 0x1fd   :  { %v317_v41 = vpop.f32.mrb[0].mxu0 }
 0x1fe   :  { %v321_v42 = vadd.f32 %v317_v41, %v156_v40  ;;  %v414_v43 = vpop.f32.mrb[1].mxu0 }
 0x200   :  { %322 = vst [vmem:[#allocation10] sm:$0xff] %v321_v42 }
 0x201   :  { %556 = shalt.err (!%p553_p8)
}
 0x202   :  { %s557_s20 = scalar_lea.hbm %s695_s5, 128 }
 0x203   :  { %p558_p9 = scmp.ne.s32.totalorder %s695_s5, %s557_s20  ;;  %p561_p10 = scmp.lt.u32.totalorder %s557_s20, %s695_s5 }
 0x205   :  { %p563_p11 = pnand %p561_p10, %p558_p9 }
 0x207   :  { %566 = shalt.err (!%p563_p11)
}
 0x208   :  { %332 = dma.vmem_to_hbm [thread:$0]  %s330_s17, 128, %s695_s5, [#allocation4]  }
 0x209   :  { %573 = dma.done.wait [#allocation4], 128  }
 0x20a   :  { %574 = vsyncadd [#allocation4], 4294967168 }
 0x20b   :  { %336 = vsyncpa [#allocation3], 1 }
 0x20c   :  { %337 = vsyncpa [#allocation6], 1 }
 0x20d   :  { %338 = vsyncpa [#allocation9], 1 }
 0x20e   :  { %339 = vsyncpa [#allocation4], 1 }

</bundles_post_ra>
